<compile_context>
chip_gen: v7x
topology: tpu7x:2x2x1
jax: 0.10.0
libtpu: 0.0.40
codegen_flags: <defaults>
</compile_context>

<pallas_src>
import jax
import jax.numpy as jnp
from jax.experimental import pallas as pl
from jax.experimental.pallas import tpu as pltpu

_LANE = 128
_SUBLANE = 8


def _round_up(x, m):
    return ((x + m - 1) // m) * m


def _pad_width(d):
    # Lane padding for a layer's output width.  Widths <=128 pad to a single
    # lane group; wider layers pad to multiples of 256 so the 2x256 MXUs on
    # v6e/v7x see full tiles (v5e's 4x128 MXU just sees two tiles).
    if d <= _LANE:
        return _LANE
    return _round_up(d, 2 * _LANE)


# ---------------------------------------------------------------------------
# Parameter packing (done once, outside the hot path)
# ---------------------------------------------------------------------------
def pack_dense_nn_params(params, dim_x, dim_ctx=0, matmul_dtype=jnp.bfloat16):
    """Pack per-layer (W, b) into lane-dense slabs.

    params[i] = (W_i, b_i) with W_i of shape (in_i, out_i); W_0's input dim is
    dim_x + dim_ctx (context-augmented first layer, as in the PyTorch module).
    Weights are stored directly in `matmul_dtype` (pass None for bit-exact f32);
    biases stay f32 (accumulation is always f32).
    """
    wdt = jnp.float32 if matmul_dtype is None else matmul_dtype
    n_layers = len(params)
    out_dims = [int(w.shape[1]) for w, _ in params]
    out_dim = out_dims[-1]
    opad = _pad_width(out_dim)                              # last-layer width
    wpad = _pad_width(max(out_dims[:-1])) if n_layers > 1 else opad

    xk = _round_up(dim_x, _SUBLANE)
    ck = _round_up(dim_ctx, _SUBLANE) if dim_ctx else 0

    w0, _ = params[0]
    assert int(w0.shape[0]) == dim_x + dim_ctx, "layer-0 weight / dims mismatch"
    w0_out_pad = wpad if n_layers > 1 else opad

    def padw(w, rpad, cpad):
        w = jnp.asarray(w, jnp.float32)
        return jnp.pad(w, ((0, rpad - int(w.shape[0])),
                           (0, cpad - int(w.shape[1])))).astype(wdt)

    def padb(b, cpad):
        b = jnp.asarray(b, jnp.float32)
        return jnp.pad(b, (0, cpad - int(b.shape[0])))

    w0x = padw(w0[:dim_x], xk, w0_out_pad)
    w0c = padw(w0[dim_x:], ck, w0_out_pad) if dim_ctx else None

    w_mid = None
    if n_layers > 2:
        w_mid = jnp.stack([padw(w, wpad, wpad) for w, _ in params[1:-1]],
                          axis=0)                           # (L-2, wpad, wpad)
    w_last = padw(params[-1][0], wpad, opad) if n_layers > 1 else None

    b_hid = None
    if n_layers > 1:
        b_hid = jnp.stack([padb(b, wpad) for _, b in params[:-1]], axis=0)
    b_last = padb(params[-1][1], opad).reshape(1, opad)

    flops_per_row = 2 * sum(int(w.shape[0]) * int(w.shape[1])
                            for w, _ in params)

    return dict(
        w0x=w0x, w0c=w0c, w_mid=w_mid, w_last=w_last,
        b_hid=b_hid, b_last=b_last,
        n_layers=n_layers, dim_x=dim_x, dim_ctx=dim_ctx,
        xk=xk, ck=ck, wpad=wpad, opad=opad, out_dim=out_dim,
        matmul_dtype=None if matmul_dtype is None else jnp.dtype(matmul_dtype),
        flops_per_row=flops_per_row,
    )


# ---------------------------------------------------------------------------
# Kernel
# ---------------------------------------------------------------------------
def _make_dense_nn_kernel(n_layers, has_ctx, output_bounds, compute_dtype):
    def kernel(*refs):
        it = iter(refs)
        x_ref = next(it)
        c_ref = next(it) if has_ctx else None
        w0x_ref = next(it)
        w0c_ref = next(it) if has_ctx else None
        wmid_ref = next(it) if n_layers > 2 else None
        wlast_ref = next(it) if n_layers > 1 else None
        bhid_ref = next(it) if n_layers > 1 else None
        blast_ref = next(it)
        out_ref = next(it)

        def dot32(a, b):
            return jnp.dot(a, b, preferred_element_type=jnp.float32)

        # Layer 0: the context concat is fused as a split matmul.
        acc = dot32(x_ref[...], w0x_ref[...])
        if has_ctx:
            acc = acc + dot32(c_ref[...], w0c_ref[...])

        if n_layers == 1:
            acc = acc + blast_ref[...]
        else:
            acc = acc + bhid_ref[pl.ds(0, 1), :]
            # f32 accumulation; inter-layer activation kept in compute_dtype.
            h = jnp.maximum(acc, 0.0).astype(compute_dtype)
            for i in range(1, n_layers - 1):
                acc = dot32(h, wmid_ref[i - 1]) + bhid_ref[pl.ds(i, 1), :]
                h = jnp.maximum(acc, 0.0).astype(compute_dtype)
            acc = dot32(h, wlast_ref[...]) + blast_ref[...]

        # PyTorch module: ReLU after EVERY Linear (incl. last), identity
        # output_activation, then optional sigmoid bounds on top.
        h_out = jnp.maximum(acc, 0.0)
        if output_bounds is not None:
            lo = float(output_bounds[0])
            span = float(output_bounds[1]) - lo
            h_out = lo + span * jax.nn.sigmoid(h_out)   # transcendental -> EUP

        out_ref[...] = h_out.astype(out_ref.dtype)

    return kernel


# ---------------------------------------------------------------------------
# Wrapper
# ---------------------------------------------------------------------------
def dense_nn_forward(x, packed, context=None, output_bounds=None,
                     out_dtype=None, tm_max=2048, min_grid_steps=1):
    """Forward pass. `packed` comes from pack_dense_nn_params.

    min_grid_steps=2 is recommended on v7x (2 TensorCores per chip);
    out_dtype=jnp.bfloat16 halves the output HBM writeback.
    """
    n_layers = packed["n_layers"]
    dim_x, dim_ctx = packed["dim_x"], packed["dim_ctx"]
    xk, ck = packed["xk"], packed["ck"]
    wpad, opad, out_dim = packed["wpad"], packed["opad"], packed["out_dim"]
    has_ctx = dim_ctx > 0
    compute_dtype = (packed["matmul_dtype"]
                     if packed["matmul_dtype"] is not None else jnp.float32)

    assert x.shape[-1] == dim_x
    if has_ctx:
        assert context is not None and context.shape[-1] == dim_ctx

    out_dtype = jnp.dtype(out_dtype) if out_dtype is not None else x.dtype
    batch = x.shape[0]

    # Tile selection: pad batch to a multiple of 8 first, then split into near
    # equal row tiles -> padding waste is bounded by <8 rows per tile.
    pbatch8 = _round_up(max(batch, 1), _SUBLANE)
    steps = max(pl.cdiv(pbatch8, tm_max), min_grid_steps)
    tm = _round_up(pl.cdiv(pbatch8, steps), _SUBLANE)
    pbatch = steps * tm

    def prep(a, real_cols, padded_cols):
        a = a.astype(compute_dtype)            # cast once on host (halves DMA)
        pc, pr = padded_cols - real_cols, pbatch - a.shape[0]
        if pc or pr:
            a = jnp.pad(a, ((0, pr), (0, pc)))
        return a

    x = prep(x, dim_x, xk)
    if has_ctx:
        context = prep(context, dim_ctx, ck)

    inputs, in_specs = [], []

    def add(arr, spec):
        inputs.append(arr)
        in_specs.append(spec)

    # Batch-tiled activations.
    add(x, pl.BlockSpec((tm, xk), lambda i: (i, 0)))
    if has_ctx:
        add(context, pl.BlockSpec((tm, ck), lambda i: (i, 0)))
    n_act = 2 if has_ctx else 1
    # Weights / biases: constant index_map -> VMEM-resident across grid steps.
    w0_out_pad = wpad if n_layers > 1 else opad
    add(packed["w0x"], pl.BlockSpec((xk, w0_out_pad), lambda i: (0, 0)))
    if has_ctx:
        add(packed["w0c"], pl.BlockSpec((ck, w0_out_pad), lambda i: (0, 0)))
    if n_layers > 2:
        add(packed["w_mid"],
            pl.BlockSpec((n_layers - 2, wpad, wpad), lambda i: (0, 0, 0)))
    if n_layers > 1:
        add(packed["w_last"], pl.BlockSpec((wpad, opad), lambda i: (0, 0)))
        add(packed["b_hid"],
            pl.BlockSpec((n_layers - 1, wpad), lambda i: (0, 0)))
    add(packed["b_last"], pl.BlockSpec((1, opad), lambda i: (0, 0)))

    out_specs = pl.BlockSpec((tm, opad), lambda i: (i, 0))
    out_shape = jax.ShapeDtypeStruct((pbatch, opad), out_dtype)

    # Advisory cost estimate for the XLA scheduler.
    flops = packed["flops_per_row"] * pbatch
    transc = pbatch * opad if output_bounds is not None else 0
    bytes_acc = sum(int(a.size) * a.dtype.itemsize for a in inputs)
    bytes_acc += pbatch * opad * out_dtype.itemsize

    # VMEM budget: double-buffered activation/output tiles + resident weights.
    weight_bytes = sum(int(a.size) * a.dtype.itemsize for a in inputs[n_act:])
    est = (2 * tm * (xk + ck) * jnp.dtype(compute_dtype).itemsize
           + 2 * tm * opad * out_dtype.itemsize
           + 2 * weight_bytes
           + 4 * tm * max(wpad, opad) * 4)       # inter-layer h/acc headroom
    vmem_limit = None
    if est > 16 * (1 << 20):
        # Raise scoped-VMEM limit (v5e defaults to 16 MiB); stay well under
        # v7x's 64 MiB physical VMEM.
        vmem_limit = min(int(est * 1.25) + (2 << 20), 60 * (1 << 20))

    kernel = _make_dense_nn_kernel(n_layers, has_ctx, output_bounds,
                                   compute_dtype)
    out = pl.pallas_call(
        kernel,
        out_shape=out_shape,
        grid=(steps,),
        in_specs=in_specs,
        out_specs=out_specs,
        compiler_params=pltpu.CompilerParams(
            dimension_semantics=("parallel",),
            vmem_limit_bytes=vmem_limit),
        cost_estimate=pl.CostEstimate(
            flops=int(flops),
            transcendentals=int(transc),
            bytes_accessed=int(bytes_acc)),
    )(*inputs)

    # Strip batch / lane padding (everything lane-dense inside the kernel).
    return out[:batch, :out_dim]


# ---------------------------------------------------------------------------
# Init + pure-JAX reference
# ---------------------------------------------------------------------------
def init_dense_nn_params(key, dim_layers, dim_context=0):
    """nn.Linear-style init: U(-1/sqrt(in), 1/sqrt(in)); W stored as (in, out)."""
    dims = list(dim_layers)
    if dim_context:
        dims[0] += dim_context
    params = []
    for l, r in zip(dims[:-1], dims[1:]):
        key, kw, kb = jax.random.split(key, 3)
        bound = 1.0 / jnp.sqrt(jnp.float32(l))
        w = jax.random.uniform(kw, (l, r), jnp.float32, -bound, bound)
        b = jax.random.uniform(kb, (r,), jnp.float32, -bound, bound)
        params.append((w, b))
    return params


def dense_nn_reference(x, params, context=None, output_bounds=None):
    """Matches the PyTorch forward (ReLU after every Linear, then bounds)."""
    if context is not None:
        x = jnp.concatenate([x, context], axis=-1)
    h = x
    for w, b in params:
        h = jnp.maximum(h @ w + b, 0.0)
    if output_bounds is not None:
        lo, hi = output_bounds
        h = jax.nn.sigmoid(h) * (hi - lo) + lo
    return h


if __name__ == "__main__":
    key = jax.random.PRNGKey(0)
    kx, kc, kp, kx2, kp2 = jax.random.split(key, 5)

    # --- Config 1: DenseNN(16, 32, 8, dim_context=4, output_bounds=(40, 200))
    batch = 8
    dim_layers = (16, 32, 8)
    dim_context = 4
    output_bounds = (40.0, 200.0)   # e.g. heart-rate bounds

    x = jax.random.normal(kx, (batch, dim_layers[0]), jnp.float32)
    context = jax.random.normal(kc, (batch, dim_context), jnp.float32)
    params = init_dense_nn_params(kp, dim_layers, dim_context)
    ref = dense_nn_reference(x, params, context=context,
                             output_bounds=output_bounds)

    # f32 debug path (bit-tight vs. reference).
    packed_f32 = pack_dense_nn_params(params, dim_x=dim_layers[0],
                                      dim_ctx=dim_context, matmul_dtype=None)
    out_f32 = jax.block_until_ready(
        dense_nn_forward(x, packed_f32, context=context,
                         output_bounds=output_bounds))
    assert out_f32.shape == (batch, dim_layers[-1])
    assert jnp.allclose(out_f32, ref, atol=1e-5, rtol=1e-5)

    # bf16 production path: bf16 weights/operands/activations, f32 accumulation,
    # bf16 output writeback.
    packed_bf16 = pack_dense_nn_params(params, dim_x=dim_layers[0],
                                       dim_ctx=dim_context,
                                       matmul_dtype=jnp.bfloat16)
    out_bf16 = jax.block_until_ready(
        dense_nn_forward(x, packed_bf16, context=context,
                         output_bounds=output_bounds,
                         out_dtype=jnp.bfloat16))
    assert out_bf16.shape == (batch, dim_layers[-1])
    assert jnp.allclose(out_bf16.astype(jnp.float32), ref, atol=2.0, rtol=2e-2)

    # --- Config 2: deeper net, no context, no bounds, awkward batch size.
    batch2 = 37
    dim_layers2 = (16, 64, 64, 8)
    x2 = jax.random.normal(kx2, (batch2, dim_layers2[0]), jnp.float32)
    params2 = init_dense_nn_params(kp2, dim_layers2, 0)
    ref2 = dense_nn_reference(x2, params2)
    packed2 = pack_dense_nn_params(params2, dim_x=dim_layers2[0],
                                   dim_ctx=0, matmul_dtype=None)
    out2 = jax.block_until_ready(dense_nn_forward(x2, packed2))
    assert out2.shape == (batch2, dim_layers2[-1])
    assert jnp.allclose(out2, ref2, atol=1e-4, rtol=1e-3)

    print("KERNEL_OK")
</pallas_src>

<mosaic_0001>
module attributes {stable_mosaic.version = 11 : i64} {
  func.func @kernel(%arg0: i32, %arg1: memref<8x16xf32, #tpu.memory_space<vmem>>, %arg2: memref<8x8xf32, #tpu.memory_space<vmem>>, %arg3: memref<16x128xf32, #tpu.memory_space<vmem>>, %arg4: memref<8x128xf32, #tpu.memory_space<vmem>>, %arg5: memref<128x128xf32, #tpu.memory_space<vmem>>, %arg6: memref<1x128xf32, #tpu.memory_space<vmem>>, %arg7: memref<1x128xf32, #tpu.memory_space<vmem>>, %arg8: memref<8x128xf32, #tpu.memory_space<vmem>>) attributes {dimension_semantics = [#tpu.dimension_semantics<parallel>], iteration_bounds = array<i64: 1>, scalar_prefetch = 0 : i64, scratch_operands = 0 : i64, tpu.core_type = #tpu.core_type<tc>, window_params = [{transform_indices = @transform_0, window_bounds = array<i64: 8, 16>}, {transform_indices = @transform_1, window_bounds = array<i64: 8, 8>}, {pipeline_mode = #tpu.pipeline_mode<synchronous>, transform_indices = @transform_2, window_bounds = array<i64: 16, 128>}, {pipeline_mode = #tpu.pipeline_mode<synchronous>, transform_indices = @transform_3, window_bounds = array<i64: 8, 128>}, {pipeline_mode = #tpu.pipeline_mode<synchronous>, transform_indices = @transform_4, window_bounds = array<i64: 128, 128>}, {pipeline_mode = #tpu.pipeline_mode<synchronous>, transform_indices = @transform_5, window_bounds = array<i64: 1, 128>}, {pipeline_mode = #tpu.pipeline_mode<synchronous>, transform_indices = @transform_6, window_bounds = array<i64: 1, 128>}, {transform_indices = @transform_7, window_bounds = array<i64: 8, 128>}]} {
    %c0 = arith.constant 0 : index
    %c0_0 = arith.constant 0 : index
    %0 = vector.load %arg1[%c0, %c0_0] : memref<8x16xf32, #tpu.memory_space<vmem>>, vector<8x16xf32>
    %c0_1 = arith.constant 0 : index
    %c0_2 = arith.constant 0 : index
    %1 = vector.load %arg3[%c0_1, %c0_2] : memref<16x128xf32, #tpu.memory_space<vmem>>, vector<16x128xf32>
    %cst = arith.constant dense<0.000000e+00> : vector<8x128xf32>
    %2 = tpu.matmul %0, %1, %cst {dimension_numbers = #tpu.dot_dimension_numbers<[1], [0], [0], [1], [0, 0, 1, 1], [], []>} : vector<8x16xf32>, vector<16x128xf32>, vector<8x128xf32> -> vector<8x128xf32>
    %c0_3 = arith.constant 0 : index
    %c0_4 = arith.constant 0 : index
    %3 = vector.load %arg2[%c0_3, %c0_4] : memref<8x8xf32, #tpu.memory_space<vmem>>, vector<8x8xf32>
    %c0_5 = arith.constant 0 : index
    %c0_6 = arith.constant 0 : index
    %4 = vector.load %arg4[%c0_5, %c0_6] : memref<8x128xf32, #tpu.memory_space<vmem>>, vector<8x128xf32>
    %cst_7 = arith.constant dense<0.000000e+00> : vector<8x128xf32>
    %5 = tpu.matmul %3, %4, %cst_7 {dimension_numbers = #tpu.dot_dimension_numbers<[1], [0], [0], [1], [0, 0, 1, 1], [], []>} : vector<8x8xf32>, vector<8x128xf32>, vector<8x128xf32> -> vector<8x128xf32>
    %6 = arith.addf %2, %5 : vector<8x128xf32>
    %c0_8 = arith.constant 0 : index
    %c0_9 = arith.constant 0 : index
    %7 = vector.load %arg6[%c0_8, %c0_9] : memref<1x128xf32, #tpu.memory_space<vmem>>, vector<1x128xf32>
    %8 = vector.broadcast %7 : vector<1x128xf32> to vector<8x128xf32>
    %9 = arith.addf %6, %8 : vector<8x128xf32>
    %cst_10 = arith.constant 0.000000e+00 : f32
    %10 = vector.broadcast %cst_10 : f32 to vector<8x128xf32>
    %11 = arith.maximumf %9, %10 : vector<8x128xf32>
    %c0_11 = arith.constant 0 : index
    %c0_12 = arith.constant 0 : index
    %12 = vector.load %arg5[%c0_11, %c0_12] : memref<128x128xf32, #tpu.memory_space<vmem>>, vector<128x128xf32>
    %cst_13 = arith.constant dense<0.000000e+00> : vector<8x128xf32>
    %13 = tpu.matmul %11, %12, %cst_13 {dimension_numbers = #tpu.dot_dimension_numbers<[1], [0], [0], [1], [0, 0, 1, 1], [], []>} : vector<8x128xf32>, vector<128x128xf32>, vector<8x128xf32> -> vector<8x128xf32>
    %c0_14 = arith.constant 0 : index
    %c0_15 = arith.constant 0 : index
    %14 = vector.load %arg7[%c0_14, %c0_15] : memref<1x128xf32, #tpu.memory_space<vmem>>, vector<1x128xf32>
    %15 = vector.broadcast %14 : vector<1x128xf32> to vector<8x128xf32>
    %16 = arith.addf %13, %15 : vector<8x128xf32>
    %cst_16 = arith.constant 0.000000e+00 : f32
    %17 = vector.broadcast %cst_16 : f32 to vector<8x128xf32>
    %18 = arith.maximumf %16, %17 : vector<8x128xf32>
    %19 = arith.negf %18 : vector<8x128xf32>
    %20 = math.exp %19 : vector<8x128xf32>
    %cst_17 = arith.constant 1.000000e+00 : f32
    %21 = vector.broadcast %cst_17 : f32 to vector<8x128xf32>
    %22 = arith.addf %21, %20 : vector<8x128xf32>
    %23 = arith.divf %21, %22 : vector<8x128xf32>
    %cst_18 = arith.constant 1.600000e+02 : f32
    %24 = vector.broadcast %cst_18 : f32 to vector<8x128xf32>
    %25 = arith.mulf %24, %23 : vector<8x128xf32>
    %cst_19 = arith.constant 4.000000e+01 : f32
    %26 = vector.broadcast %cst_19 : f32 to vector<8x128xf32>
    %27 = arith.addf %26, %25 : vector<8x128xf32>
    %c0_20 = arith.constant 0 : index
    %c0_21 = arith.constant 0 : index
    %28 = vector.load %arg8[%c0_20, %c0_21] : memref<8x128xf32, #tpu.memory_space<vmem>>, vector<8x128xf32>
    tpu.vector_store %arg8[%c0_20, %c0_21], %27 {strides = array<i32>} : memref<8x128xf32, #tpu.memory_space<vmem>>, vector<8x128xf32>,
    return
  }
  func.func @transform_0(%arg0: i32) -> (i32, i32) {
    %c0_i32 = arith.constant 0 : i32
    %c0_i32_0 = arith.constant 0 : i32
    return %arg0, %c0_i32 : i32, i32
  }
  func.func @transform_1(%arg0: i32) -> (i32, i32) {
    %c0_i32 = arith.constant 0 : i32
    %c0_i32_0 = arith.constant 0 : i32
    return %arg0, %c0_i32 : i32, i32
  }
  func.func @transform_2(%arg0: i32) -> (i32, i32) {
    %c0_i32 = arith.constant 0 : i32
    %c0_i32_0 = arith.constant 0 : i32
    %c0_i32_1 = arith.constant 0 : i32
    return %c0_i32, %c0_i32_0 : i32, i32
  }
  func.func @transform_3(%arg0: i32) -> (i32, i32) {
    %c0_i32 = arith.constant 0 : i32
    %c0_i32_0 = arith.constant 0 : i32
    %c0_i32_1 = arith.constant 0 : i32
    return %c0_i32, %c0_i32_0 : i32, i32
  }
  func.func @transform_4(%arg0: i32) -> (i32, i32) {
    %c0_i32 = arith.constant 0 : i32
    %c0_i32_0 = arith.constant 0 : i32
    %c0_i32_1 = arith.constant 0 : i32
    return %c0_i32, %c0_i32_0 : i32, i32
  }
  func.func @transform_5(%arg0: i32) -> (i32, i32) {
    %c0_i32 = arith.constant 0 : i32
    %c0_i32_0 = arith.constant 0 : i32
    %c0_i32_1 = arith.constant 0 : i32
    return %c0_i32, %c0_i32_0 : i32, i32
  }
  func.func @transform_6(%arg0: i32) -> (i32, i32) {
    %c0_i32 = arith.constant 0 : i32
    %c0_i32_0 = arith.constant 0 : i32
    %c0_i32_1 = arith.constant 0 : i32
    return %c0_i32, %c0_i32_0 : i32, i32
  }
  func.func @transform_7(%arg0: i32) -> (i32, i32) {
    %c0_i32 = arith.constant 0 : i32
    %c0_i32_0 = arith.constant 0 : i32
    return %arg0, %c0_i32 : i32, i32
  }
}

</mosaic_0001>

<bundles_post_ra>
// kernel: tpu_custom_call.1
= control target key start
LH: loop header
LB: loop body
LE: loop exit
PB: predicated region body
PF: predicated region fallthrough
CT: control target
= control target key end

     0   :  { %12 = vsyncpa [#allocation3], 0  ;;  %s715_s0 = inlined_call_operand.hbm [shape: f32[8,16], index: 0, kind: input, shape index: {}]   ;;  %s716_s1 = inlined_call_operand.hbm [shape: f32[8,8], index: 1, kind: input, shape index: {}]   ;;  %s717_s2 = inlined_call_operand.hbm [shape: f32[16,128], index: 2, kind: input, shape index: {}]   ;;  %s718_s3 = inlined_call_operand.vmem [shape: f32[8,128], index: 3, kind: input, shape index: {}]   ;;  %s719_s4 = inlined_call_operand.hbm [shape: f32[128,128], index: 4, kind: input, shape index: {}]   ;;  %s720_s5 = inlined_call_operand.vmem [shape: f32[1,128], index: 5, kind: input, shape index: {}]   ;;  %s721_s6 = inlined_call_operand.vmem [shape: f32[1,128], index: 6, kind: input, shape index: {}]   ;;  %s722_s7 = inlined_call_operand.hbm [shape: f32[8,128], index: 7, kind: output, shape index: {}]  }
   0x1   :  { %13 = vsyncpa [#allocation6], 0 }
   0x2   :  { %14 = vsyncpa [#allocation9], 0 }
   0x3   :  { %15 = vsyncpa [#allocation4], 0  ;;  %s593_s24 = smov [#allocation5]   ;;  %s594_s26 = smov [#allocation2]  }
   0x4   :  { %s32_s25 = sshll.u32 %s593_s24, 4  ;;  %s22_s27 = sshll.u32 %s594_s26, 4  ;;  %s33_s25 = int_to_ptr.vmem [resolvable:$true] %s32_s25  ;;  %s23_s27 = int_to_ptr.vmem [resolvable:$true] %s22_s27 }
   0x5   :  { %s475_s30 = scalar_lea.hbm %s716_s1, 128 }
   0x6   :  { %p476_p0 = scmp.ne.s32.totalorder %s716_s1, %s475_s30  ;;  %p479_p1 = scmp.lt.u32.totalorder %s475_s30, %s716_s1 }
   0x8   :  { %p481_p2 = pnand %p479_p1, %p476_p0 }
   0xa   :  { %484 = shalt.err (!%p481_p2)
}
   0xb   :  { %s485_s12 = scalar_lea.vmem %s33_s25, 128  ;;  %p490_p4 = scmp.lt.s32.totalorder %s33_s25, %s33_s25 }
   0xc   :  { %p486_p3 = scmp.ne.s32.totalorder %s33_s25, %s485_s12  ;;  %p491_p5 = scmp.lt.s32.totalorder %s485_s12, %s485_s12 }
   0xe   :  { %p492_p6 = por %p491_p5, %p490_p4 }
  0x10   :  { %p493_p7 = pnand %p492_p6, %p486_p3 }
  0x12   :  { %496 = shalt.err (!%p493_p7)
}
  0x13   :  { %35 = dma.hbm_to_vmem [thread:$0]  %s716_s1, 128, %s33_s25, [#allocation6]  }
  0x14   :  { %s497_s17 = scalar_lea.hbm %s715_s0, 128 }
  0x15   :  { %p498_p8 = scmp.ne.s32.totalorder %s715_s0, %s497_s17  ;;  %p501_p9 = scmp.lt.u32.totalorder %s497_s17, %s715_s0 }
  0x17   :  { %p503_p10 = pnand %p501_p9, %p498_p8 }
  0x19   :  { %506 = shalt.err (!%p503_p10)
}
  0x1a   :  { %s507_s22 = scalar_lea.vmem %s23_s27, 128  ;;  %p512_p12 = scmp.lt.s32.totalorder %s23_s27, %s23_s27 }
  0x1b   :  { %p508_p11 = scmp.ne.s32.totalorder %s23_s27, %s507_s22  ;;  %p513_p13 = scmp.lt.s32.totalorder %s507_s22, %s507_s22 }
  0x1d   :  { %p514_p0 = por %p513_p13, %p512_p12 }
  0x1f   :  { %p515_p1 = pnand %p514_p0, %p508_p11 }
  0x21   :  { %518 = shalt.err (!%p515_p1)
}
  0x22   :  { %25 = dma.hbm_to_vmem [thread:$0]  %s715_s0, 128, %s23_s27, [#allocation3]  }
  0x23   :  { %s595_s24 = smov [#allocation7]   ;;  %s519_s29 = scalar_lea.hbm %s717_s2, 256 }
  0x24   :  { %s41_s25 = sshll.u32 %s595_s24, 4  ;;  %p520_p2 = scmp.ne.s32.totalorder %s717_s2, %s519_s29  ;;  %s42_s25 = int_to_ptr.vmem [resolvable:$true] %s41_s25 }
  0x25   :  { %p523_p3 = scmp.lt.u32.totalorder %s519_s29, %s717_s2 }
  0x27   :  { %p525_p4 = pnand %p523_p3, %p520_p2 }
  0x29   :  { %528 = shalt.err (!%p525_p4)
}
  0x2a   :  { %s529_s11 = scalar_lea.vmem %s42_s25, 256  ;;  %p534_p6 = scmp.lt.s32.totalorder %s42_s25, %s42_s25 }
  0x2b   :  { %p530_p5 = scmp.ne.s32.totalorder %s42_s25, %s529_s11  ;;  %p535_p7 = scmp.lt.s32.totalorder %s529_s11, %s529_s11 }
  0x2d   :  { %p536_p8 = por %p535_p7, %p534_p6 }
  0x2f   :  { %p537_p9 = pnand %p536_p8, %p530_p5 }
  0x31   :  { %540 = shalt.err (!%p537_p9)
}
  0x32   :  { %s596_s0 = smov 128   ;;  %s597_s27 = smov 8  }
  0x33   :  { %47 = dma.hbm_to_vmem [thread:$0]  %s717_s2, 256, %s42_s25, [#allocation6], %s596_s0, %s596_s0, %s597_s27  }
  0x34   :  { %s598_s14 = smov [#allocation8]   ;;  %s541_s18 = scalar_lea.hbm %s719_s4, 2048 }
  0x35   :  { %s55_s15 = sshll.u32 %s598_s14, 4  ;;  %p542_p10 = scmp.ne.s32.totalorder %s719_s4, %s541_s18  ;;  %s56_s15 = int_to_ptr.vmem [resolvable:$true] %s55_s15 }
  0x36   :  { %p545_p11 = scmp.lt.u32.totalorder %s541_s18, %s719_s4 }
  0x38   :  { %p547_p12 = pnand %p545_p11, %p542_p10 }
  0x3a   :  { %550 = shalt.err (!%p547_p12)
}
  0x3b   :  { %s551_s1 = scalar_lea.vmem %s56_s15, 2048  ;;  %p556_p0 = scmp.lt.s32.totalorder %s56_s15, %s56_s15 }
  0x3c   :  { %p552_p13 = scmp.ne.s32.totalorder %s56_s15, %s551_s1  ;;  %p557_p1 = scmp.lt.s32.totalorder %s551_s1, %s551_s1 }
  0x3e   :  { %p558_p2 = por %p557_p1, %p556_p0 }
  0x40   :  { %p559_p3 = pnand %p558_p2, %p552_p13 }
  0x42   :  { %562 = shalt.err (!%p559_p3)
}
  0x43   :  { %61 = dma.hbm_to_vmem [thread:$0]  %s719_s4, 2048, %s56_s15, [#allocation9], %s596_s0, %s596_s0, %s597_s27  }
  0x44   :  { %585 = dma.done.wait [#allocation3], 128  }
  0x45   :  { %586 = vsyncadd [#allocation3], 4294967168 }
  0x46   :  { %587 = dma.done.wait [#allocation6], 384  }
  0x47   :  { %588 = vsyncadd [#allocation6], 4294966912 }
  0x48   :  { %589 = dma.done.wait [#allocation9], 2048  }
  0x49   :  { %590 = vsyncadd [#allocation9], 4294965248  ;;  %v599_v0 = vmov 0.0   ;;  %vm600_vm0 = vmmov 0   ;;  %v601_v1 = vmov 0.0|0.0   ;;  %vm83_vm1 = vcmask 64512  }
  0x4a   :  { %387 = vmatprep.subr.mxu1 %v599_v0  ;;  %389 = vmatprep.mubr.msk.f32.mxu1 %vm600_vm0, %v599_v0  ;;  %v82_v2 = vld [vmem:[%s718_s3] sm:$0xff]  ;;  %v81_v3 = vld [vmem:[#allocation5] sm:$0xff]  ;;  %v79_v4 = vld [vmem:[#allocation7] sm:$0xff]  ;;  %vm157_vm2 = vcmask 130048  }
  0x4b   :  { %437 = vmatprep.subr.bf16.mxu0 %v601_v1  ;;  %431 = vmatprep.mubr.msk.f32.mxu0 %vm600_vm0, %v599_v0  ;;  %v80_v5 = vld [vmem:[#allocation7 + $0x8] sm:$0xff]  ;;  %v240_v6 = vld [vmem:[#allocation8] sm:$0xff]  ;;  %v241_v8 = vld [vmem:[#allocation8 + $0x8] sm:$0xff] }
  0x4c   :  { %388 = vmatpush3.msra.mxu1 %v82_v2  ;;  %v435_v7 = vpack.c.bf16 %v80_v5, %v79_v4  ;;  %v242_v9 = vld [vmem:[#allocation8 + $0x10] sm:$0xff]  ;;  %v243_v10 = vld [vmem:[#allocation8 + $0x18] sm:$0xff]  ;;  %v438_v11 = vpack.c.bf16 %v241_v8, %v240_v6  ;;  %v78_v12 = vld [vmem:[#allocation2] sm:$0xff] }
  0x4d   :  { %390 = vmatmul.mubr.msk.f32.vlgmr.msra.gmra.mrb[0].mxu1 %vm83_vm1, %v81_v3  ;;  %434 = vmatprep.subr.bf16.mxu1 %v601_v1  ;;  %v441_v13 = vpack.c.bf16 %v243_v10, %v242_v9  ;;  %v244_v14 = vld [vmem:[#allocation8 + $0x20] sm:$0xff]  ;;  %v245_v15 = vld [vmem:[#allocation8 + $0x28] sm:$0xff]  ;;  %v246_v17 = vld [vmem:[#allocation8 + $0x30] sm:$0xff] }
  0x4e   :  { %396 = vmatprep.mubr.msk.f32.mxu1 %vm600_vm0, %v599_v0  ;;  %436 = vmatpush3.bf16.msra.mxu1 %v435_v7  ;;  %v444_v16 = vpack.c.bf16 %v245_v15, %v244_v14  ;;  %v247_v18 = vld [vmem:[#allocation8 + $0x38] sm:$0xff]  ;;  %v248_v20 = vld [vmem:[#allocation8 + $0x40] sm:$0xff]  ;;  %v249_v21 = vld [vmem:[#allocation8 + $0x48] sm:$0xff] }
  0x4f   :  { %439 = vmatpush3.bf16.msra.mxu0 %v438_v11  ;;  %v447_v19 = vpack.c.bf16 %v247_v18, %v246_v17  ;;  %v450_v22 = vpack.c.bf16 %v249_v21, %v248_v20  ;;  %v250_v23 = vld [vmem:[#allocation8 + $0x50] sm:$0xff]  ;;  %v251_v24 = vld [vmem:[#allocation8 + $0x58] sm:$0xff]  ;;  %v252_v26 = vld [vmem:[#allocation8 + $0x60] sm:$0xff] }
  0x50   :  { %440 = vmatprep.subr.bf16.mxu0 %v601_v1  ;;  %v453_v25 = vpack.c.bf16 %v251_v24, %v250_v23  ;;  %v253_v27 = vld [vmem:[#allocation8 + $0x68] sm:$0xff]  ;;  %v254_v29 = vld [vmem:[#allocation8 + $0x70] sm:$0xff]  ;;  %v255_v30 = vld [vmem:[#allocation8 + $0x78] sm:$0xff] }
  0x51   :  { %397 = vmatmul.mubr.msk.f32.vlgmr.msra.gmra.mrb[2].mxu1 %vm157_vm2, %v78_v12  ;;  %v456_v28 = vpack.c.bf16 %v253_v27, %v252_v26  ;;  %v459_v31 = vpack.c.bf16 %v255_v30, %v254_v29  ;;  %v362_v35 = vld [vmem:[%s720_s5] ss:$0 sm:$0xff]  ;;  %s602_s5 = smov [#allocation10]  }
  0x52   :  { %v363_v40 = vld [vmem:[%s721_s6] ss:$0 sm:$0xff]  ;;  %s349_s29 = sshll.u32 %s602_s5, 4  ;;  %s350_s29 = int_to_ptr.vmem [resolvable:$true] %s349_s29 }
  0x53   :  { %442 = vmatpush3.bf16.msra.mxu0 %v441_v13  ;;  %s563_s30 = scalar_lea.vmem %s350_s29, 128  ;;  %p568_p5 = scmp.lt.s32.totalorder %s350_s29, %s350_s29 }
  0x54   :  { %443 = vmatprep.subr.bf16.mxu0 %v601_v1  ;;  %p564_p4 = scmp.ne.s32.totalorder %s350_s29, %s563_s30  ;;  %p569_p6 = scmp.lt.s32.totalorder %s563_s30, %s563_s30 }
  0x56   :  { %p570_p7 = por %p569_p6, %p568_p5 }
  0x57   :  { %445 = vmatpush3.bf16.msra.mxu0 %v444_v16 }
  0x58   :  { %446 = vmatprep.subr.bf16.mxu0 %v601_v1  ;;  %p571_p8 = pnand %p570_p7, %p564_p4 }
  0x5b   :  { %448 = vmatpush3.bf16.msra.mxu0 %v447_v19 }
  0x5c   :  { %449 = vmatprep.subr.bf16.mxu0 %v601_v1 }
  0x5f   :  { %451 = vmatpush3.bf16.msra.mxu0 %v450_v22 }
  0x60   :  { %452 = vmatprep.subr.bf16.mxu0 %v601_v1 }
  0x63   :  { %454 = vmatpush3.bf16.msra.mxu0 %v453_v25 }
  0x64   :  { %455 = vmatprep.subr.bf16.mxu0 %v601_v1 }
  0x67   :  { %457 = vmatpush3.bf16.msra.mxu0 %v456_v28 }
  0x68   :  { %458 = vmatprep.subr.bf16.mxu0 %v601_v1 }
  0x6b   :  { %460 = vmatpush3.bf16.msra.mxu0 %v459_v31 }
 0x120   :  { %v153_v32 = vpop.f32.mrb[0].mxu1 }
 0x121   :  { %v391_v33 = vpop.f32.mrb[1].mxu1 }
 0x124   :  { %v227_v34 = vpop.f32.mrb[2].mxu1 }
 0x125   :  { %v228_v36 = vadd.f32 %v227_v34, %v153_v32  ;;  %v398_v37 = vpop.f32.mrb[3].mxu1 }
 0x127   :  { %v238_v38 = vadd.f32 %v362_v35, %v228_v36 }
 0x129   :  { %v239_v39 = vmax.f32 %v238_v38, 0.0 }
 0x12b   :  { %432 = vmatmul.mubr.f32.vlgmr.msra.gmra.mrb[0].mxu0 %v239_v39 }
 0x1fe   :  { %v329_v41 = vpop.f32.mrb[0].mxu0 }
 0x1ff   :  { %v330_v42 = vadd.f32 %v363_v40, %v329_v41  ;;  %v433_v43 = vpop.f32.mrb[1].mxu0 }
 0x201   :  { %v333_v44 = vmax.f32 %v330_v42, 0.0 }
 0x203   :  { %v364_v45 = vmul.f32 -1.442695, %v333_v44 }
 0x205   :  { %471 = vpow2.f32 %v364_v45 }
 0x20f   :  { %v472_v46 = vpop.eup %471 }
 0x210   :  { %v337_v47 = vadd.f32 1.0, %v472_v46 }
 0x212   :  { %473 = vrcp.f32 %v337_v47 }
 0x21c   :  { %v474_v48 = vpop.eup %473 }
 0x21d   :  { %v340_v49 = vmul.f32 160.0, %v474_v48 }
 0x21f   :  { %v341_v50 = vadd.f32 40.0, %v340_v49 }
 0x221   :  { %342 = vst [vmem:[#allocation10] sm:$0xff] %v341_v50 }
 0x222   :  { %574 = shalt.err (!%p571_p8)
}
 0x223   :  { %s575_s9 = scalar_lea.hbm %s722_s7, 128 }
 0x224   :  { %p576_p9 = scmp.ne.s32.totalorder %s722_s7, %s575_s9  ;;  %p579_p10 = scmp.lt.u32.totalorder %s575_s9, %s722_s7 }
 0x226   :  { %p581_p11 = pnand %p579_p10, %p576_p9 }
 0x228   :  { %584 = shalt.err (!%p581_p11)
}
 0x229   :  { %352 = dma.vmem_to_hbm [thread:$0]  %s350_s29, 128, %s722_s7, [#allocation4]  }
 0x22a   :  { %591 = dma.done.wait [#allocation4], 128  }
 0x22b   :  { %592 = vsyncadd [#allocation4], 4294967168 }
 0x22c   :  { %356 = vsyncpa [#allocation3], 1 }
 0x22d   :  { %357 = vsyncpa [#allocation6], 1 }
 0x22e   :  { %358 = vsyncpa [#allocation9], 1 }
 0x22f   :  { %359 = vsyncpa [#allocation4], 1 }

</bundles_post_ra>
